<compile_context>
chip_gen: v7x
topology: tpu7x:2x2x1
jax: 0.10.0
libtpu: 0.0.40
codegen_flags: <defaults>
</compile_context>

<pallas_src>
import jax
import jax.numpy as jnp
from jax.experimental import pallas as pl
from jax.experimental.pallas import tpu as pltpu


def _round_up(x, m):
    return ((x + m - 1) // m) * m


# ---------------------------------------------------------------------------
# Kernels
# ---------------------------------------------------------------------------
def _linear_kernel_f32out(x_ref, w_ref, b_ref, o_ref):
    """f32 output: accumulate directly into the resident output tile.

    x_ref: (tile_b, tile_k)   activation tile
    w_ref: (tile_k, tile_n)   K-major weight tile (MXU-native RHS)
    b_ref: (1, tile_n)        bias tile
    o_ref: (tile_b, tile_n)   f32 output tile, resident across K steps
    """
    k = pl.program_id(2)

    @pl.when(k == 0)
    def _init():
        # seed the accumulator with the (broadcast) bias once per output tile
        o_ref[...] = jnp.zeros_like(o_ref) + b_ref[...]

    o_ref[...] += jnp.dot(x_ref[...], w_ref[...],
                          preferred_element_type=jnp.float32)


def _linear_kernel_acc(x_ref, w_ref, b_ref, o_ref, acc_ref):
    """Low-precision output: f32 VMEM accumulator, cast at the last K step."""
    k = pl.program_id(2)

    @pl.when(k == 0)
    def _init():
        acc_ref[...] = jnp.zeros_like(acc_ref)

    acc_ref[...] += jnp.dot(x_ref[...], w_ref[...],
                            preferred_element_type=jnp.float32)

    @pl.when(k == pl.num_programs(2) - 1)
    def _finalize():
        o_ref[...] = (acc_ref[...]
                      + b_ref[...].astype(jnp.float32)).astype(o_ref.dtype)


# ---------------------------------------------------------------------------
# Parameter init / one-time layout packing
# ---------------------------------------------------------------------------
def init_classifier_params(key, inputs, class_num):
    # matches: weight.data.normal_(0, 0.01); bias.data.fill_(0.0)
    weight = 0.01 * jax.random.normal(key, (class_num, inputs), dtype=jnp.float32)
    bias = jnp.zeros((class_num,), dtype=jnp.float32)
    return weight, bias


def pack_classifier_params(weight, bias, *, compute_dtype=None, max_untiled_k=2048):
    """One-time layout prep (call once at load time, NOT per forward).

    weight: (class_num, inputs) PyTorch layout; bias: (class_num,).
    Returns a dict with the K-major, 128-padded weight and padded bias.
    compute_dtype: optionally jnp.bfloat16 to halve weight HBM bytes
                   (keep f32 accumulation; loosen test tolerances).
    """
    N, K = weight.shape
    assert bias.shape == (N,)
    N_pad = _round_up(N, 128)

    if K <= max_untiled_k:
        tile_k, K_pad = K, K                 # full-K blocks, no K padding
    else:
        tile_k = 512                         # multiple of 128 (lane dim of x blocks)
        K_pad = _round_up(K, tile_k)         # zero-pad: exact for the reduction

    w_t = jnp.pad(weight.T, ((0, K_pad - K), (0, N_pad - N)))   # (K_pad, N_pad)
    b = jnp.pad(bias, (0, N_pad - N)).reshape(1, N_pad)
    if compute_dtype is not None:
        w_t = w_t.astype(compute_dtype)

    return dict(w_t=w_t, b=b, n=N, k=K, tile_k=tile_k, compute_dtype=compute_dtype)


# ---------------------------------------------------------------------------
# Forward
# ---------------------------------------------------------------------------
def classifier_forward(x, params, *, tile_b=None, tile_n=None, out_dtype=None):
    """x: (B, inputs); params: output of pack_classifier_params."""
    w_t, b = params["w_t"], params["b"]
    N, K, tile_k = params["n"], params["k"], params["tile_k"]
    compute_dtype = params["compute_dtype"]
    K_pad, N_pad = w_t.shape
    B = x.shape[0]
    assert x.shape[1] == K
    out_dtype = jnp.dtype(out_dtype) if out_dtype is not None else jnp.dtype(x.dtype)

    if compute_dtype is not None:
        x = x.astype(compute_dtype)
    if K_pad != K:
        # zero-pad activations along K (cheap: x is the small operand)
        x = jnp.pad(x, ((0, 0), (0, K_pad - K)))

    # ---- tile selection -----------------------------------------------------
    sub = 16 if x.dtype == jnp.bfloat16 else 8       # bf16 packs 2 rows / sublane
    if tile_b is None:
        tile_b = min(_round_up(B, sub), 256)
    else:
        tile_b = min(_round_up(tile_b, sub), _round_up(B, sub))
    if tile_n is None:
        tile_n = min(N_pad, 256)
    else:
        tile_n = min(_round_up(tile_n, 128), N_pad)
    # v7x megacore: keep >=2 blocks on a parallel axis whenever N_pad allows it.
    if pl.cdiv(B, tile_b) == 1 and pl.cdiv(N_pad, tile_n) == 1 and N_pad > 128:
        tile_n = _round_up(pl.cdiv(N_pad, 2), 128)

    grid = (pl.cdiv(B, tile_b), pl.cdiv(N_pad, tile_n), pl.cdiv(K_pad, tile_k))

    use_acc = out_dtype != jnp.float32
    xw_bytes = jnp.dtype(x.dtype).itemsize
    w_bytes = jnp.dtype(w_t.dtype).itemsize
    out_bytes = out_dtype.itemsize

    # double-buffered VMEM estimate; budget against v7x's 64 MiB physical VMEM
    vmem_est = (2 * tile_b * tile_k * xw_bytes            # x tiles
                + 2 * tile_k * tile_n * w_bytes           # weight tiles
                + 2 * tile_n * 4                          # bias tiles
                + 2 * tile_b * tile_n * out_bytes)        # output tiles
    if use_acc:
        vmem_est += tile_b * tile_n * 4                   # f32 accumulator
    vmem_limit = int(min(max(2 * vmem_est, 32 << 20), 48 << 20))

    cost = pl.CostEstimate(
        flops=2 * B * K_pad * N_pad,
        transcendentals=0,
        bytes_accessed=(B * K_pad * xw_bytes
                        + K_pad * N_pad * w_bytes
                        + B * N_pad * out_bytes))

    in_specs = [
        pl.BlockSpec((tile_b, tile_k), lambda i, j, k: (i, k)),   # x
        pl.BlockSpec((tile_k, tile_n), lambda i, j, k: (k, j)),   # weight (K-major)
        pl.BlockSpec((1, tile_n), lambda i, j, k: (0, j)),        # bias
    ]
    out_spec = pl.BlockSpec((tile_b, tile_n), lambda i, j, k: (i, j))

    kernel = _linear_kernel_acc if use_acc else _linear_kernel_f32out
    scratch = [pltpu.VMEM((tile_b, tile_n), jnp.float32)] if use_acc else []

    out = pl.pallas_call(
        kernel,
        out_shape=jax.ShapeDtypeStruct((B, N_pad), out_dtype),
        grid_spec=pltpu.PrefetchScalarGridSpec(
            num_scalar_prefetch=0,
            grid=grid,
            in_specs=in_specs,
            out_specs=out_spec,
            scratch_shapes=scratch,
        ),
        compiler_params=pltpu.CompilerParams(
            dimension_semantics=("parallel", "parallel", "arbitrary"),
            vmem_limit_bytes=vmem_limit),
        cost_estimate=cost,
    )(x, w_t, b)

    # TODO(synk): in training pipelines return the padded logits and mask at
    # the loss to avoid this per-call slice copy when class_num % 128 != 0.
    return out[:, :N] if N_pad != N else out


if __name__ == "__main__":
    key = jax.random.PRNGKey(0)
    k_x, k_w = jax.random.split(key)

    batch, inputs, class_num = 8, 32, 16
    x = jax.random.normal(k_x, (batch, inputs), dtype=jnp.float32)
    weight, bias = init_classifier_params(k_w, inputs, class_num)

    # One-time layout prep (hoisted out of the forward pass).
    params = pack_classifier_params(weight, bias)

    out = classifier_forward(x, params)
    out = jax.block_until_ready(out)

    # reference check in plain JAX
    ref = x @ weight.T + bias
    assert out.shape == (batch, class_num)
    assert jnp.allclose(out, ref, atol=1e-5, rtol=1e-5)

    print("KERNEL_OK")
</pallas_src>

<mosaic_0001>
module attributes {stable_mosaic.version = 11 : i64} {
  func.func @_linear_kernel_f32out(%arg0: i32, %arg1: i32, %arg2: i32, %arg3: memref<8x32xf32, #tpu.memory_space<vmem>>, %arg4: memref<32x128xf32, #tpu.memory_space<vmem>>, %arg5: memref<1x128xf32, #tpu.memory_space<vmem>>, %arg6: memref<8x128xf32, #tpu.memory_space<vmem>>) attributes {dimension_semantics = [#tpu.dimension_semantics<parallel>, #tpu.dimension_semantics<parallel>, #tpu.dimension_semantics<arbitrary>], iteration_bounds = array<i64: 1, 1, 1>, scalar_prefetch = 0 : i64, scratch_operands = 0 : i64, tpu.core_type = #tpu.core_type<tc>, window_params = [{transform_indices = @transform_0, window_bounds = array<i64: 8, 32>}, {transform_indices = @transform_1, window_bounds = array<i64: 32, 128>}, {transform_indices = @transform_2, window_bounds = array<i64: 1, 128>}, {transform_indices = @transform_3, window_bounds = array<i64: 8, 128>}]} {
    %c0_i32 = arith.constant 0 : i32
    %0 = arith.cmpi eq, %arg2, %c0_i32 : i32
    %1 = arith.extui %0 : i1 to i32
    %c0_i32_0 = arith.constant 0 : i32
    %2 = arith.cmpi ne, %1, %c0_i32_0 : i32
    scf.if %2 {
      %cst_8 = arith.constant 0.000000e+00 : f32
      %9 = vector.broadcast %cst_8 : f32 to vector<8x128xf32>
      %c0_9 = arith.constant 0 : index
      %c0_10 = arith.constant 0 : index
      %10 = vector.load %arg5[%c0_9, %c0_10] : memref<1x128xf32, #tpu.memory_space<vmem>>, vector<1x128xf32>
      %11 = vector.broadcast %10 : vector<1x128xf32> to vector<8x128xf32>
      %12 = arith.addf %9, %11 : vector<8x128xf32>
      %c0_11 = arith.constant 0 : index
      %c0_12 = arith.constant 0 : index
      %13 = vector.load %arg6[%c0_11, %c0_12] : memref<8x128xf32, #tpu.memory_space<vmem>>, vector<8x128xf32>
      tpu.vector_store %arg6[%c0_11, %c0_12], %12 {strides = array<i32>} : memref<8x128xf32, #tpu.memory_space<vmem>>, vector<8x128xf32>,
    } else {
    }
    %c0 = arith.constant 0 : index
    %c0_1 = arith.constant 0 : index
    %3 = vector.load %arg6[%c0, %c0_1] : memref<8x128xf32, #tpu.memory_space<vmem>>, vector<8x128xf32>
    %c0_2 = arith.constant 0 : index
    %c0_3 = arith.constant 0 : index
    %4 = vector.load %arg3[%c0_2, %c0_3] : memref<8x32xf32, #tpu.memory_space<vmem>>, vector<8x32xf32>
    %c0_4 = arith.constant 0 : index
    %c0_5 = arith.constant 0 : index
    %5 = vector.load %arg4[%c0_4, %c0_5] : memref<32x128xf32, #tpu.memory_space<vmem>>, vector<32x128xf32>
    %cst = arith.constant dense<0.000000e+00> : vector<8x128xf32>
    %6 = tpu.matmul %4, %5, %cst {dimension_numbers = #tpu.dot_dimension_numbers<[1], [0], [0], [1], [0, 0, 1, 1], [], []>} : vector<8x32xf32>, vector<32x128xf32>, vector<8x128xf32> -> vector<8x128xf32>
    %7 = arith.addf %3, %6 : vector<8x128xf32>
    %c0_6 = arith.constant 0 : index
    %c0_7 = arith.constant 0 : index
    %8 = vector.load %arg6[%c0_6, %c0_7] : memref<8x128xf32, #tpu.memory_space<vmem>>, vector<8x128xf32>
    tpu.vector_store %arg6[%c0_6, %c0_7], %7 {strides = array<i32>} : memref<8x128xf32, #tpu.memory_space<vmem>>, vector<8x128xf32>,
    return
  }
  func.func @transform_0(%arg0: i32, %arg1: i32, %arg2: i32) -> (i32, i32) {
    %c0_i32 = arith.constant 0 : i32
    return %arg0, %arg2 : i32, i32
  }
  func.func @transform_1(%arg0: i32, %arg1: i32, %arg2: i32) -> (i32, i32) {
    %c0_i32 = arith.constant 0 : i32
    return %arg2, %arg1 : i32, i32
  }
  func.func @transform_2(%arg0: i32, %arg1: i32, %arg2: i32) -> (i32, i32) {
    %c0_i32 = arith.constant 0 : i32
    %c0_i32_0 = arith.constant 0 : i32
    return %c0_i32, %arg1 : i32, i32
  }
  func.func @transform_3(%arg0: i32, %arg1: i32, %arg2: i32) -> (i32, i32) {
    %c0_i32 = arith.constant 0 : i32
    return %arg0, %arg1 : i32, i32
  }
}

</mosaic_0001>

<bundles_post_ra>
// kernel: tpu_custom_call.1
= control target key start
LH: loop header
LB: loop body
LE: loop exit
PB: predicated region body
PF: predicated region fallthrough
CT: control target
= control target key end

     0   :  { %8 = vsyncpa [#allocation3], 0  ;;  %s330_s0 = inlined_call_operand.hbm [shape: f32[8,32], index: 0, kind: input, shape index: {}]   ;;  %s331_s1 = inlined_call_operand.hbm [shape: f32[32,128], index: 1, kind: input, shape index: {}]   ;;  %s332_s2 = inlined_call_operand.vmem [shape: f32[1,128], index: 2, kind: input, shape index: {}]   ;;  %s333_s3 = inlined_call_operand.hbm [shape: f32[8,128], index: 3, kind: output, shape index: {}]  }
   0x1   :  { %9 = vsyncpa [#allocation6], 0 }
   0x2   :  { %10 = vsyncpa [#allocation4], 0  ;;  %s256_s12 = smov [#allocation2]   ;;  %s257_s14 = smov [#allocation5]  }
   0x3   :  { %s17_s13 = sshll.u32 %s256_s12, 4  ;;  %s26_s15 = sshll.u32 %s257_s14, 4  ;;  %s18_s13 = int_to_ptr.vmem [resolvable:$true] %s17_s13  ;;  %s284_s15 = int_to_ptr.vmem [resolvable:$true] %s26_s15 }
   0x4   :  { %s184_s18 = scalar_lea.hbm %s330_s0, 128 }
   0x5   :  { %p185_p0 = scmp.ne.s32.totalorder %s330_s0, %s184_s18  ;;  %p188_p1 = scmp.lt.u32.totalorder %s184_s18, %s330_s0 }
   0x7   :  { %p190_p2 = pnand %p188_p1, %p185_p0 }
   0x9   :  { %193 = shalt.err (!%p190_p2)
}
   0xa   :  { %s194_s23 = scalar_lea.vmem %s18_s13, 128  ;;  %p199_p4 = scmp.lt.s32.totalorder %s18_s13, %s18_s13 }
   0xb   :  { %p195_p3 = scmp.ne.s32.totalorder %s18_s13, %s194_s23  ;;  %p200_p5 = scmp.lt.s32.totalorder %s194_s23, %s194_s23 }
   0xd   :  { %p201_p6 = por %p200_p5, %p199_p4 }
   0xf   :  { %p202_p7 = pnand %p201_p6, %p195_p3 }
  0x11   :  { %205 = shalt.err (!%p202_p7)
}
  0x12   :  { %20 = dma.hbm_to_vmem [thread:$0]  %s330_s0, 128, %s18_s13, [#allocation3]  }
  0x13   :  { %s206_s28 = scalar_lea.hbm %s331_s1, 512 }
  0x14   :  { %p207_p8 = scmp.ne.s32.totalorder %s331_s1, %s206_s28  ;;  %p210_p9 = scmp.lt.u32.totalorder %s206_s28, %s331_s1 }
  0x16   :  { %p212_p10 = pnand %p210_p9, %p207_p8 }
  0x18   :  { %215 = shalt.err (!%p212_p10)
}
  0x19   :  { %s216_s6 = scalar_lea.vmem %s284_s15, 512  ;;  %p221_p12 = scmp.lt.s32.totalorder %s284_s15, %s284_s15 }
  0x1a   :  { %p217_p11 = scmp.ne.s32.totalorder %s284_s15, %s216_s6  ;;  %p222_p13 = scmp.lt.s32.totalorder %s216_s6, %s216_s6 }
  0x1c   :  { %p223_p0 = por %p222_p13, %p221_p12 }
  0x1e   :  { %p224_p1 = pnand %p223_p0, %p217_p11 }
  0x20   :  { %227 = shalt.err (!%p224_p1)
}
  0x21   :  { %s258_s0 = smov 128   ;;  %s259_s7 = smov 8  }
  0x22   :  { %32 = dma.hbm_to_vmem [thread:$0]  %s331_s1, 512, %s284_s15, [#allocation6], %s258_s0, %s258_s0, %s259_s7  }
  0x23   :  { %250 = dma.done.wait [#allocation3], 128  }
  0x24   :  { %251 = vsyncadd [#allocation3], 4294967168 }
  0x25   :  { %252 = dma.done.wait [#allocation6], 512  }
  0x26   :  { %253 = vsyncadd [#allocation6], 4294966784  ;;  %v260_v0 = vmov 0.0|0.0   ;;  %vm261_vm0 = vmmov 0   ;;  %v262_v1 = vmov 0.0   ;;  %v56_v2 = vld [vmem:[#allocation5] sm:$0xff] }
  0x27   :  { %170 = vmatprep.subr.bf16.mxu0 %v260_v0  ;;  %167 = vmatprep.mubr.msk.f32.mxu0 %vm261_vm0, %v262_v1  ;;  %v57_v3 = vld [vmem:[#allocation5 + $0x8] sm:$0xff]  ;;  %v58_v5 = vld [vmem:[#allocation5 + $0x10] sm:$0xff]  ;;  %v59_v6 = vld [vmem:[#allocation5 + $0x18] sm:$0xff]  ;;  %vm60_vm1 = vcmask 261120   ;;  %s263_s11 = smov [#allocation7]  }
  0x28   :  { %v171_v4 = vpack.c.bf16 %v57_v3, %v56_v2  ;;  %v174_v7 = vpack.c.bf16 %v59_v6, %v58_v5  ;;  %v55_v8 = vld [vmem:[#allocation2] sm:$0xff]  ;;  %s142_s12 = sshll.u32 %s263_s11, 4  ;;  %s143_s12 = int_to_ptr.vmem [resolvable:$true] %s142_s12 }
  0x29   :  { %v152_v9 = vld [vmem:[%s332_s2] ss:$0 sm:$0xff]  ;;  %s228_s13 = scalar_lea.vmem %s143_s12, 128  ;;  %p233_p3 = scmp.lt.s32.totalorder %s143_s12, %s143_s12 }
  0x2a   :  { %172 = vmatpush3.bf16.msra.mxu0 %v171_v4  ;;  %p229_p2 = scmp.ne.s32.totalorder %s143_s12, %s228_s13  ;;  %p234_p4 = scmp.lt.s32.totalorder %s228_s13, %s228_s13 }
  0x2b   :  { %173 = vmatprep.subr.bf16.mxu0 %v260_v0 }
  0x2c   :  { %p235_p5 = por %p234_p4, %p233_p3 }
  0x2e   :  { %175 = vmatpush3.bf16.msra.mxu0 %v174_v7  ;;  %p236_p6 = pnand %p235_p5, %p229_p2 }
  0x31   :  { %168 = vmatmul.mubr.msk.f32.vlgmr.msra.gmra.mrb[0].mxu0 %vm60_vm1, %v55_v8 }
 0x104   :  { %v130_v10 = vpop.f32.mrb[0].mxu0 }
 0x105   :  { %v134_v11 = vadd.f32 %v152_v9, %v130_v10  ;;  %v169_v12 = vpop.f32.mrb[1].mxu0 }
 0x107   :  { %135 = vst [vmem:[#allocation7] sm:$0xff] %v134_v11 }
 0x108   :  { %239 = shalt.err (!%p236_p6)
}
 0x109   :  { %s240_s16 = scalar_lea.hbm %s333_s3, 128 }
 0x10a   :  { %p241_p7 = scmp.ne.s32.totalorder %s333_s3, %s240_s16  ;;  %p244_p8 = scmp.lt.u32.totalorder %s240_s16, %s333_s3 }
 0x10c   :  { %p246_p9 = pnand %p244_p8, %p241_p7 }
 0x10e   :  { %249 = shalt.err (!%p246_p9)
}
 0x10f   :  { %145 = dma.vmem_to_hbm [thread:$0]  %s143_s12, 128, %s333_s3, [#allocation4]  }
 0x110   :  { %254 = dma.done.wait [#allocation4], 128  }
 0x111   :  { %255 = vsyncadd [#allocation4], 4294967168 }
 0x112   :  { %149 = vsyncpa [#allocation3], 1 }
 0x113   :  { %150 = vsyncpa [#allocation6], 1 }
 0x114   :  { %151 = vsyncpa [#allocation4], 1 }

</bundles_post_ra>
